<compile_context>
chip_gen: v7x
topology: tpu7x:2x2x1
jax: 0.10.0
libtpu: 0.0.40
codegen_flags: <defaults>
</compile_context>

<pallas_src>
import jax
import jax.numpy as jnp
from jax.experimental import pallas as pl
from jax.experimental.pallas import tpu as pltpu

T = 1000
HIDDEN = 128
TB_MAX = 8192      # max batch tile (lanes per grid step), multiple of 128
_W3_ROWS = 8       # layer-3 lhs padded to 8 sublanes for a clean MXU shape


def _round_up(n, m):
    return ((n + m - 1) // m) * m


def _elementwise_dtype():
    """bf16 elementwise math on v6e/v7x (bf16 VALU); f32 on v5e and older."""
    try:
        kind = jax.devices()[0].device_kind.lower()
    except Exception:
        return jnp.float32
    if any(s in kind for s in ("v2", "v3", "v4", "v5")):
        return jnp.float32
    return jnp.bfloat16


def _choose_tb(B, tb_max):
    """Lane-dense tile (multiple of 128); >=2 grid steps for mid/large B so
    the 'parallel' batch axis can be split across v7x's two TensorCores."""
    half = _round_up(max(pl.cdiv(B, 2), 1), 128)
    return int(min(tb_max, half))


def mlp_kernel(xt_ref, w1x_ref, w1t_ref, b1_ref, w2t_ref, b2_ref, w3t_ref,
               b3_ref, o_ref):
    ew = w1x_ref.dtype                      # elementwise compute dtype
    xt = xt_ref[...].astype(ew)             # (2, TB): row 0 = x, row 1 = raw t
    x_row = xt[0:1, :]                      # (1, TB)
    t_row = xt[1:2, :]                      # (1, TB); 1/T already folded into w1t

    # --- Layer 1: Linear(2 -> 128) + ReLU as VPU column-broadcast FMAs ------
    h = w1x_ref[...] * x_row + w1t_ref[...] * t_row + b1_ref[...]   # (128, TB)
    h = jnp.maximum(h, 0).astype(jnp.bfloat16)

    # --- Layer 2: Linear(128 -> 128) + ReLU on the MXU (bf16, f32 acc) ------
    h2 = jnp.dot(w2t_ref[...], h, preferred_element_type=jnp.float32)  # (128, TB)
    h2 = jnp.maximum(h2.astype(ew) + b2_ref[...], 0).astype(jnp.bfloat16)

    # --- Layer 3: Linear(128 -> 1) on the MXU, lane-dense (1, TB) output ----
    y = jnp.dot(w3t_ref[...], h2, preferred_element_type=jnp.float32)  # (8, TB)
    o_ref[...] = (y[0:1, :] + b3_ref[0]).astype(o_ref.dtype)


def simple_mlp_forward(x, t, params, *, tb=None):
    """x: (B, dim) f32, t: (B,) int/float -> (B, dim) f32.  Requires dim == 1."""
    w1, b1, w2, b2, w3, b3 = params
    B, dim = x.shape
    assert dim == 1, "torch SimpleMLP only shape-checks for dim == 1"
    out_dim = w3.shape[1]

    ew = _elementwise_dtype()

    # Single packed, lane-dense input stream: [x ; raw t] as (2, B) f32.
    xt = jnp.concatenate(
        [x.astype(jnp.float32).T, t.astype(jnp.float32).reshape(1, B)], axis=0)

    # Layer-1 parameters as (128, 1) columns; fold 1/T into the t column once.
    w1x = w1[0].reshape(HIDDEN, 1).astype(ew)
    w1t = (w1[1] / T).reshape(HIDDEN, 1).astype(ew)
    b1c = b1.reshape(HIDDEN, 1).astype(ew)
    # Layer-2/3 MXU operands (transposed, bf16).
    w2t = jnp.transpose(w2).astype(jnp.bfloat16)             # (128, 128) (out, in)
    b2c = b2.reshape(HIDDEN, 1).astype(ew)
    w3t = jnp.zeros((_W3_ROWS, HIDDEN), jnp.bfloat16).at[0:out_dim, :].set(
        jnp.transpose(w3).astype(jnp.bfloat16))               # (8, 128), rows 1..7 zero
    b3s = b3.reshape(out_dim).astype(jnp.float32)             # (1,) SMEM scalar

    if tb is None:
        tb = _choose_tb(B, TB_MAX)
    else:
        tb = max(128, _round_up(int(tb), 128))                # lane-dense tile
    grid = (pl.cdiv(B, tb),)                                  # masked partial last block

    const2 = lambda i: (0, 0)                                 # weights stay VMEM-resident
    in_specs = [
        pl.BlockSpec((2, tb), lambda i: (0, i)),              # packed [x; t]
        pl.BlockSpec((HIDDEN, 1), const2),                    # w1 x-column
        pl.BlockSpec((HIDDEN, 1), const2),                    # w1 t-column (/T folded)
        pl.BlockSpec((HIDDEN, 1), const2),                    # b1
        pl.BlockSpec((HIDDEN, HIDDEN), const2),               # w2^T (bf16)
        pl.BlockSpec((HIDDEN, 1), const2),                    # b2
        pl.BlockSpec((_W3_ROWS, HIDDEN), const2),             # w3^T padded (bf16)
        pl.BlockSpec(memory_space=pltpu.MemorySpace.SMEM),    # b3 scalar
    ]
    out_specs = pl.BlockSpec((out_dim, tb), lambda i: (0, i))

    cost = pl.CostEstimate(
        flops=2 * B * HIDDEN * (2 + HIDDEN + out_dim),
        transcendentals=0,
        bytes_accessed=(B * (2 + out_dim) * 4                 # xt in, out
                        + HIDDEN * HIDDEN * 2                 # w2^T bf16
                        + _W3_ROWS * HIDDEN * 2               # w3^T bf16
                        + 4 * HIDDEN * 4                      # w1x, w1t, b1, b2
                        + out_dim * 4),                       # b3
    )

    out = pl.pallas_call(
        mlp_kernel,
        out_shape=jax.ShapeDtypeStruct((out_dim, B), jnp.float32),
        grid=grid,
        in_specs=in_specs,
        out_specs=out_specs,
        compiler_params=pltpu.CompilerParams(
            dimension_semantics=("parallel",),
            vmem_limit_bytes=32 * 1024 * 1024),
        cost_estimate=cost,
    )(xt, w1x, w1t, b1c, w2t, b2c, w3t, b3s)
    return jnp.transpose(out)                                 # (B, out_dim)


def init_params(key, dim):
    """Deterministic synthetic init (uniform, PyTorch-Linear-style scale)."""
    in0 = dim + 1
    ks = jax.random.split(key, 6)

    def lin(kw, kb, fan_in, fan_out):
        bound = 1.0 / jnp.sqrt(jnp.float32(fan_in))
        w = jax.random.uniform(kw, (fan_in, fan_out), jnp.float32, -bound, bound)
        b = jax.random.uniform(kb, (1, fan_out), jnp.float32, -bound, bound)
        return w, b

    w1, b1 = lin(ks[0], ks[1], in0, HIDDEN)
    w2, b2 = lin(ks[2], ks[3], HIDDEN, HIDDEN)
    w3, b3 = lin(ks[4], ks[5], HIDDEN, dim)
    return (w1, b1, w2, b2, w3, b3)


def reference_forward(x, t, params):
    """Pure-f32 JAX reference matching the PyTorch module exactly."""
    w1, b1, w2, b2, w3, b3 = params
    dim = x.shape[1]
    t_embed = jnp.tile((t[:, None].astype(jnp.float32) / T), (1, dim))
    h = jnp.concatenate([x.astype(jnp.float32), t_embed], axis=1)
    h = jnp.maximum(h @ w1 + b1, 0.0)
    h = jnp.maximum(h @ w2 + b2, 0.0)
    return h @ w3 + b3


if __name__ == "__main__":
    dim = 1  # dim must be 1 for the torch module's cat/Linear shapes to agree
    key = jax.random.PRNGKey(0)
    kx, kt, kp, kx2, kt2 = jax.random.split(key, 5)
    params = init_params(kp, dim)

    # (B=8): single-block path.  (B=1000): multi-step grid + partial last block.
    for B, kxi, kti in ((8, kx, kt), (1000, kx2, kt2)):
        x = jax.random.normal(kxi, (B, dim), jnp.float32)
        t = jax.random.randint(kti, (B,), 0, T, jnp.int32)

        out = jax.block_until_ready(simple_mlp_forward(x, t, params))
        ref = reference_forward(x, t, params)

        assert out.shape == (B, dim)
        # Layers 2/3 use bf16 MXU operands (f32 accumulate) -> loosened tolerance
        # vs. the pure-f32 reference.
        max_err = float(jnp.max(jnp.abs(out - ref)))
        assert jnp.allclose(out, ref, atol=5e-2, rtol=5e-2), max_err

    print("KERNEL_OK")
</pallas_src>

<mosaic_0001>
module attributes {stable_mosaic.version = 11 : i64} {
  func.func @mlp_kernel(%arg0: i32, %arg1: memref<2x128xf32, #tpu.memory_space<vmem>>, %arg2: memref<128x1xbf16, #tpu.memory_space<vmem>>, %arg3: memref<128x1xbf16, #tpu.memory_space<vmem>>, %arg4: memref<128x1xbf16, #tpu.memory_space<vmem>>, %arg5: memref<128x128xbf16, #tpu.memory_space<vmem>>, %arg6: memref<128x1xbf16, #tpu.memory_space<vmem>>, %arg7: memref<8x128xbf16, #tpu.memory_space<vmem>>, %arg8: memref<1xf32, #tpu.memory_space<smem>>, %arg9: memref<1x128xf32, #tpu.memory_space<vmem>>) attributes {dimension_semantics = [#tpu.dimension_semantics<parallel>], iteration_bounds = array<i64: 1>, scalar_prefetch = 0 : i64, scratch_operands = 0 : i64, tpu.core_type = #tpu.core_type<tc>, window_params = [{transform_indices = @transform_0, window_bounds = array<i64: 2, 128>}, {pipeline_mode = #tpu.pipeline_mode<synchronous>, transform_indices = @transform_1, window_bounds = array<i64: 128, 1>}, {pipeline_mode = #tpu.pipeline_mode<synchronous>, transform_indices = @transform_2, window_bounds = array<i64: 128, 1>}, {pipeline_mode = #tpu.pipeline_mode<synchronous>, transform_indices = @transform_3, window_bounds = array<i64: 128, 1>}, {pipeline_mode = #tpu.pipeline_mode<synchronous>, transform_indices = @transform_4, window_bounds = array<i64: 128, 128>}, {pipeline_mode = #tpu.pipeline_mode<synchronous>, transform_indices = @transform_5, window_bounds = array<i64: 128, 1>}, {pipeline_mode = #tpu.pipeline_mode<synchronous>, transform_indices = @transform_6, window_bounds = array<i64: 8, 128>}, {transform_indices = @transform_7, window_bounds = array<i64: 1>}, {transform_indices = @transform_8, window_bounds = array<i64: 1, 128>}]} {
    %c0 = arith.constant 0 : index
    %c0_0 = arith.constant 0 : index
    %0 = vector.load %arg1[%c0, %c0_0] : memref<2x128xf32, #tpu.memory_space<vmem>>, vector<2x128xf32>
    %1 = arith.truncf %0 : vector<2x128xf32> to vector<2x128xbf16>
    %2 = vector.extract_strided_slice %1 {offsets = [0, 0], sizes = [1, 128], strides = [1, 1]} : vector<2x128xbf16> to vector<1x128xbf16>
    %3 = vector.extract_strided_slice %1 {offsets = [1, 0], sizes = [1, 128], strides = [1, 1]} : vector<2x128xbf16> to vector<1x128xbf16>
    %c0_1 = arith.constant 0 : index
    %c0_2 = arith.constant 0 : index
    %4 = vector.load %arg2[%c0_1, %c0_2] : memref<128x1xbf16, #tpu.memory_space<vmem>>, vector<128x1xbf16>
    %5 = vector.broadcast %4 : vector<128x1xbf16> to vector<128x128xbf16>
    %6 = vector.broadcast %2 : vector<1x128xbf16> to vector<128x128xbf16>
    %7 = arith.mulf %5, %6 : vector<128x128xbf16>
    %c0_3 = arith.constant 0 : index
    %c0_4 = arith.constant 0 : index
    %8 = vector.load %arg3[%c0_3, %c0_4] : memref<128x1xbf16, #tpu.memory_space<vmem>>, vector<128x1xbf16>
    %9 = vector.broadcast %8 : vector<128x1xbf16> to vector<128x128xbf16>
    %10 = vector.broadcast %3 : vector<1x128xbf16> to vector<128x128xbf16>
    %11 = arith.mulf %9, %10 : vector<128x128xbf16>
    %12 = arith.addf %7, %11 : vector<128x128xbf16>
    %c0_5 = arith.constant 0 : index
    %c0_6 = arith.constant 0 : index
    %13 = vector.load %arg4[%c0_5, %c0_6] : memref<128x1xbf16, #tpu.memory_space<vmem>>, vector<128x1xbf16>
    %14 = vector.broadcast %13 : vector<128x1xbf16> to vector<128x128xbf16>
    %15 = arith.addf %12, %14 : vector<128x128xbf16>
    %cst = arith.constant 0.000000e+00 : bf16
    %16 = vector.broadcast %cst : bf16 to vector<128x128xbf16>
    %17 = arith.maximumf %15, %16 : vector<128x128xbf16>
    %c0_7 = arith.constant 0 : index
    %c0_8 = arith.constant 0 : index
    %18 = vector.load %arg5[%c0_7, %c0_8] : memref<128x128xbf16, #tpu.memory_space<vmem>>, vector<128x128xbf16>
    %cst_9 = arith.constant dense<0.000000e+00> : vector<128x128xf32>
    %19 = tpu.matmul %18, %17, %cst_9 {dimension_numbers = #tpu.dot_dimension_numbers<[1], [0], [0], [1], [0, 0, 1, 1], [], []>} : vector<128x128xbf16>, vector<128x128xbf16>, vector<128x128xf32> -> vector<128x128xf32>
    %20 = arith.truncf %19 : vector<128x128xf32> to vector<128x128xbf16>
    %c0_10 = arith.constant 0 : index
    %c0_11 = arith.constant 0 : index
    %21 = vector.load %arg6[%c0_10, %c0_11] : memref<128x1xbf16, #tpu.memory_space<vmem>>, vector<128x1xbf16>
    %22 = vector.broadcast %21 : vector<128x1xbf16> to vector<128x128xbf16>
    %23 = arith.addf %20, %22 : vector<128x128xbf16>
    %cst_12 = arith.constant 0.000000e+00 : bf16
    %24 = vector.broadcast %cst_12 : bf16 to vector<128x128xbf16>
    %25 = arith.maximumf %23, %24 : vector<128x128xbf16>
    %c0_13 = arith.constant 0 : index
    %c0_14 = arith.constant 0 : index
    %26 = vector.load %arg7[%c0_13, %c0_14] : memref<8x128xbf16, #tpu.memory_space<vmem>>, vector<8x128xbf16>
    %cst_15 = arith.constant dense<0.000000e+00> : vector<8x128xf32>
    %27 = tpu.matmul %26, %25, %cst_15 {dimension_numbers = #tpu.dot_dimension_numbers<[1], [0], [0], [1], [0, 0, 1, 1], [], []>} : vector<8x128xbf16>, vector<128x128xbf16>, vector<8x128xf32> -> vector<8x128xf32>
    %28 = vector.extract_strided_slice %27 {offsets = [0, 0], sizes = [1, 128], strides = [1, 1]} : vector<8x128xf32> to vector<1x128xf32>
    %c0_16 = arith.constant 0 : index
    %29 = memref.load %arg8[%c0_16] : memref<1xf32, #tpu.memory_space<smem>>
    %30 = vector.broadcast %29 : f32 to vector<1x128xf32>
    %31 = arith.addf %28, %30 : vector<1x128xf32>
    %c0_17 = arith.constant 0 : index
    %c0_18 = arith.constant 0 : index
    %32 = vector.load %arg9[%c0_17, %c0_18] : memref<1x128xf32, #tpu.memory_space<vmem>>, vector<1x128xf32>
    tpu.vector_store %arg9[%c0_17, %c0_18], %31 {strides = array<i32>} : memref<1x128xf32, #tpu.memory_space<vmem>>, vector<1x128xf32>,
    return
  }
  func.func @transform_0(%arg0: i32) -> (i32, i32) {
    %c0_i32 = arith.constant 0 : i32
    %c0_i32_0 = arith.constant 0 : i32
    return %c0_i32, %arg0 : i32, i32
  }
  func.func @transform_1(%arg0: i32) -> (i32, i32) {
    %c0_i32 = arith.constant 0 : i32
    %c0_i32_0 = arith.constant 0 : i32
    %c0_i32_1 = arith.constant 0 : i32
    return %c0_i32, %c0_i32_0 : i32, i32
  }
  func.func @transform_2(%arg0: i32) -> (i32, i32) {
    %c0_i32 = arith.constant 0 : i32
    %c0_i32_0 = arith.constant 0 : i32
    %c0_i32_1 = arith.constant 0 : i32
    return %c0_i32, %c0_i32_0 : i32, i32
  }
  func.func @transform_3(%arg0: i32) -> (i32, i32) {
    %c0_i32 = arith.constant 0 : i32
    %c0_i32_0 = arith.constant 0 : i32
    %c0_i32_1 = arith.constant 0 : i32
    return %c0_i32, %c0_i32_0 : i32, i32
  }
  func.func @transform_4(%arg0: i32) -> (i32, i32) {
    %c0_i32 = arith.constant 0 : i32
    %c0_i32_0 = arith.constant 0 : i32
    %c0_i32_1 = arith.constant 0 : i32
    return %c0_i32, %c0_i32_0 : i32, i32
  }
  func.func @transform_5(%arg0: i32) -> (i32, i32) {
    %c0_i32 = arith.constant 0 : i32
    %c0_i32_0 = arith.constant 0 : i32
    %c0_i32_1 = arith.constant 0 : i32
    return %c0_i32, %c0_i32_0 : i32, i32
  }
  func.func @transform_6(%arg0: i32) -> (i32, i32) {
    %c0_i32 = arith.constant 0 : i32
    %c0_i32_0 = arith.constant 0 : i32
    %c0_i32_1 = arith.constant 0 : i32
    return %c0_i32, %c0_i32_0 : i32, i32
  }
  func.func @transform_7(%arg0: i32) -> i32 {
    %c0_i32 = arith.constant 0 : i32
    %c0_i32_0 = arith.constant 0 : i32
    return %c0_i32 : i32
  }
  func.func @transform_8(%arg0: i32) -> (i32, i32) {
    %c0_i32 = arith.constant 0 : i32
    %c0_i32_0 = arith.constant 0 : i32
    return %c0_i32, %arg0 : i32, i32
  }
}

</mosaic_0001>

<bundles_post_ra>
// kernel: tpu_custom_call.1
= control target key start
LH: loop header
LB: loop body
LE: loop exit
PB: predicated region body
PF: predicated region fallthrough
CT: control target
= control target key end

     0   :  { %v1450_v2 = vmov 0   ;;  %s1874_s0 = inlined_call_operand.vmem [shape: f32[2,8], index: 0, kind: input, shape index: {}]   ;;  %s1875_s1 = inlined_call_operand.vmem [shape: bf16[128,1], index: 1, kind: input, shape index: {}]   ;;  %s1876_s2 = inlined_call_operand.vmem [shape: bf16[128,1], index: 2, kind: input, shape index: {}]   ;;  %s1877_s3 = inlined_call_operand.vmem [shape: bf16[128,1], index: 3, kind: input, shape index: {}]   ;;  %s1878_s4 = inlined_call_operand.vmem [shape: bf16[128,128], index: 4, kind: input, shape index: {}]   ;;  %s1879_s5 = inlined_call_operand.vmem [shape: bf16[128,1], index: 5, kind: input, shape index: {}]   ;;  %s1880_s6 = inlined_call_operand.vmem [shape: bf16[8,128], index: 6, kind: input, shape index: {}]   ;;  %s1881_s7 = inlined_call_operand.<no memory space> [shape: f32[1], index: 7, kind: input, shape index: {}]   ;;  %s1882_s8 = inlined_call_operand.hbm [shape: f32[1,8], index: 8, kind: output, shape index: {}]  }
   0x1   :  { %v269_v0 = vld [vmem:[%s1876_s2] sm:$0xf]  ;;  %1417 = vset.pattern.permute.xlu1 %v1450_v2  ;;  %1416 = vset.pattern.permute.xlu0 %v1450_v2  ;;  %v270_v3 = vld [vmem:[%s1876_s2 + $0x4] sm:$0xf]  ;;  %v37_v5 = vld [vmem:[%s1875_s1 + $0xc] sm:$0xf] }
   0x2   :  { %v34_v1 = vld [vmem:[%s1875_s1] sm:$0xf]  ;;  %287 = vperm.xlu1 %1417, %v269_v0   ;;  %v35_v4 = vld [vmem:[%s1875_s1 + $0x4] sm:$0xf]  ;;  %v36_v6 = vld [vmem:[%s1875_s1 + $0x8] sm:$0xf] }
   0x3   :  { %52 = vperm.xlu0 %1416, %v34_v1   ;;  %v272_v7 = vld [vmem:[%s1876_s2 + $0xc] sm:$0xf]  ;;  %v271_v8 = vld [vmem:[%s1876_s2 + $0x8] sm:$0xf]  ;;  %v521_v9 = vld [vmem:[%s1877_s3 + $0x4] sm:$0xf] }
   0x4   :  { %v520_v10 = vld [vmem:[%s1877_s3] sm:$0xf]  ;;  %v39_v11 = vld [vmem:[%s1875_s1 + $0x14] sm:$0xf]  ;;  %v38_v12 = vld [vmem:[%s1875_s1 + $0x10] sm:$0xf] }
   0x5   :  { %v274_v13 = vld [vmem:[%s1876_s2 + $0x14] sm:$0xf]  ;;  %v273_v14 = vld [vmem:[%s1876_s2 + $0x10] sm:$0xf]  ;;  %v523_v15 = vld [vmem:[%s1877_s3 + $0xc] sm:$0xf] }
   0x6   :  { %299 = vperm.xlu1 %1417, %v270_v3   ;;  %v522_v16 = vld [vmem:[%s1877_s3 + $0x8] sm:$0xf] }
   0x7   :  { %64 = vperm.xlu0 %1416, %v35_v4  }
   0xa   :  { %88 = vperm.xlu1 %1417, %v37_v5  }
   0xb   :  { %76 = vperm.xlu0 %1416, %v36_v6  }
   0xe   :  { %323 = vperm.xlu1 %1417, %v272_v7  }
   0xf   :  { %311 = vperm.xlu0 %1416, %v271_v8  }
  0x12   :  { %550 = vperm.xlu1 %1417, %v521_v9  }
  0x13   :  { %538 = vperm.xlu0 %1416, %v520_v10  }
  0x16   :  { %112 = vperm.xlu1 %1417, %v39_v11  }
  0x17   :  { %100 = vperm.xlu0 %1416, %v38_v12  }
  0x1a   :  { %347 = vperm.xlu1 %1417, %v274_v13  }
  0x1b   :  { %335 = vperm.xlu0 %1416, %v273_v14  }
  0x1c   :  { %14 = vsyncpa [#allocation4], 0  ;;  %v41_v17 = vld [vmem:[%s1875_s1 + $0x1c] sm:$0xf]  ;;  %v40_v18 = vld [vmem:[%s1875_s1 + $0x18] sm:$0xf]  ;;  %v58_v1 = vlaneseq }
  0x1d   :  { %v276_v19 = vld [vmem:[%s1876_s2 + $0x1c] sm:$0xf]  ;;  %v275_v20 = vld [vmem:[%s1876_s2 + $0x18] sm:$0xf]  ;;  %v525_v21 = vld [vmem:[%s1877_s3 + $0x14] sm:$0xf] }
  0x1e   :  { %574 = vperm.xlu1 %1417, %v523_v15   ;;  %v524_v22 = vld [vmem:[%s1877_s3 + $0x10] sm:$0xf]  ;;  %v43_v23 = vld [vmem:[%s1875_s1 + $0x24] sm:$0xf]  ;;  %v42_v24 = vld [vmem:[%s1875_s1 + $0x20] sm:$0xf] }
  0x1f   :  { %562 = vperm.xlu0 %1416, %v522_v16   ;;  %v278_v25 = vld [vmem:[%s1876_s2 + $0x24] sm:$0xf]  ;;  %v277_v26 = vld [vmem:[%s1876_s2 + $0x20] sm:$0xf]  ;;  %v527_v27 = vld [vmem:[%s1877_s3 + $0x1c] sm:$0xf] }
  0x20   :  { %v526_v28 = vld [vmem:[%s1877_s3 + $0x18] sm:$0xf]  ;;  %v45_v29 = vld [vmem:[%s1875_s1 + $0x2c] sm:$0xf]  ;;  %v44_v30 = vld [vmem:[%s1875_s1 + $0x28] sm:$0xf] }
  0x21   :  { %v280_v31 = vld [vmem:[%s1876_s2 + $0x2c] sm:$0xf]  ;;  %v279_v32 = vld [vmem:[%s1876_s2 + $0x28] sm:$0xf]  ;;  %v529_v33 = vld [vmem:[%s1877_s3 + $0x24] sm:$0xf] }
  0x22   :  { %136 = vperm.xlu1 %1417, %v41_v17   ;;  %v528_v34 = vld [vmem:[%s1877_s3 + $0x20] sm:$0xf]  ;;  %v47_v35 = vld [vmem:[%s1875_s1 + $0x34] sm:$0xf]  ;;  %v46_v36 = vld [vmem:[%s1875_s1 + $0x30] sm:$0xf] }
  0x23   :  { %124 = vperm.xlu0 %1416, %v40_v18   ;;  %v282_v37 = vld [vmem:[%s1876_s2 + $0x34] sm:$0xf]  ;;  %v281_v38 = vld [vmem:[%s1876_s2 + $0x30] sm:$0xf]  ;;  %v531_v39 = vld [vmem:[%s1877_s3 + $0x2c] sm:$0xf] }
  0x24   :  { %v530_v40 = vld [vmem:[%s1877_s3 + $0x28] sm:$0xf]  ;;  %v49_v41 = vld [vmem:[%s1875_s1 + $0x3c] sm:$0xf]  ;;  %v48_v42 = vld [vmem:[%s1875_s1 + $0x38] sm:$0xf] }
  0x25   :  { %v284_v43 = vld [vmem:[%s1876_s2 + $0x3c] sm:$0xf]  ;;  %v283_v44 = vld [vmem:[%s1876_s2 + $0x38] sm:$0xf]  ;;  %v533_v45 = vld [vmem:[%s1877_s3 + $0x34] sm:$0xf] }
  0x26   :  { %371 = vperm.xlu1 %1417, %v276_v19   ;;  %v532_v46 = vld [vmem:[%s1877_s3 + $0x30] sm:$0xf]  ;;  %v535_v47 = vld [vmem:[%s1877_s3 + $0x3c] sm:$0xf]  ;;  %v534_v48 = vld [vmem:[%s1877_s3 + $0x38] sm:$0xf] }
  0x27   :  { %359 = vperm.xlu0 %1416, %v275_v20   ;;  %v978_v49 = vld [vmem:[%s1879_s5 + $0x4] sm:$0xf]  ;;  %v977_v50 = vld [vmem:[%s1879_s5] sm:$0xf]  ;;  %v980_v51 = vld [vmem:[%s1879_s5 + $0xc] sm:$0xf] }
  0x28   :  { %v979_v52 = vld [vmem:[%s1879_s5 + $0x8] sm:$0xf]  ;;  %v982_v53 = vld [vmem:[%s1879_s5 + $0x14] sm:$0xf]  ;;  %v981_v54 = vld [vmem:[%s1879_s5 + $0x10] sm:$0xf] }
  0x29   :  { %v1418_v55 = vld [vmem:[%s1878_s4] sm:$0xff]   ;;  %v984_v56 = vld [vmem:[%s1879_s5 + $0x1c] sm:$0xf]  ;;  %v983_v57 = vld [vmem:[%s1879_s5 + $0x18] sm:$0xf]  ;;  %v59_v6 = vshrl.u32 %v58_v1, 7 }
  0x2a   :  { %598 = vperm.xlu1 %1417, %v525_v21   ;;  %1375 = vmatprep.mubr.bf16.mxu0 %v1418_v55  ;;  %v986_v58 = vld [vmem:[%s1879_s5 + $0x24] sm:$0xf]  ;;  %v985_v59 = vld [vmem:[%s1879_s5 + $0x20] sm:$0xf]  ;;  %v988_v60 = vld [vmem:[%s1879_s5 + $0x2c] sm:$0xf] }
  0x2b   :  { %586 = vperm.xlu0 %1416, %v524_v22   ;;  %v987_v61 = vld [vmem:[%s1879_s5 + $0x28] sm:$0xf]  ;;  %v32_v62 = vld [vmem:[%s1874_s0] sm:$0x3]  ;;  %v990_v63 = vld [vmem:[%s1879_s5 + $0x34] sm:$0xf] }
  0x2c   :  { %v989_v0 = vld [vmem:[%s1879_s5 + $0x30] sm:$0xf]  ;;  %v33_v3 = vpack.c.bf16 %v32_v62, %v32_v62  ;;  %v992_v4 = vld [vmem:[%s1879_s5 + $0x3c] sm:$0xf]  ;;  %v991_v5 = vld [vmem:[%s1879_s5 + $0x38] sm:$0xf] }
  0x2d   :  { %v1451_v8 = vmov 839922192   ;;  %v247_v10 = vsub.s32 0, %v59_v6  ;;  %vm1453_vm0 = vmmov 0   ;;  %s1454_s12 = smov [#allocation3]  }
  0x2e   :  { %160 = vperm.xlu1 %1417, %v43_v23   ;;  %v477_v7 = vshrl.u32 %v33_v3, 16  ;;  %v56_v9 = vunpack.c.l.s4 %v1451_v8  ;;  %v243_v14 = vpack.i.b16 %v33_v3, %v33_v3  ;;  %s1300_s13 = sshll.u32 %s1454_s12, 4  ;;  %s1301_s13 = int_to_ptr.vmem [resolvable:$true] %s1300_s13 }
  0x2f   :  { %148 = vperm.xlu0 %1416, %v42_v24   ;;  %s1426_s14 = scalar_lea.vmem %s1301_s13, 16  ;;  %s1430_s15 = scalar_lea.vmem %s1301_s13, 32 }
  0x30   :  { %v478_v12 = vpack.i.b16 %v477_v7, %v477_v7  ;;  %v57_v15 = vunpack.c.0.s8 %v56_v9  ;;  %v248_v17 = vrot.slane %v243_v14, %v247_v10  ;;  %p1427_p0 = scmp.ne.s32.totalorder %s1301_s13, %s1426_s14  ;;  %p1431_p1 = scmp.lt.s32.totalorder %s1301_s13, %s1301_s13 }
  0x31   :  { %p1432_p2 = scmp.lt.s32.totalorder %s1430_s15, %s1426_s14 }
  0x32   :  { %395 = vperm.xlu1 %1417, %v278_v25   ;;  %v483_v16 = vrot.slane %v478_v12, %v247_v10  ;;  %v1700_v20 = vsub.s32 %v57_v15, %v59_v6  ;;  %v1704_v22 = vcombine.low %v248_v17, %v248_v17 }
  0x33   :  { %383 = vperm.xlu0 %1416, %v277_v26   ;;  %p1433_p3 = por %p1432_p2, %p1431_p1 }
  0x34   :  { %v1702_v21 = vcombine.low %v483_v16, %v483_v16 }
  0x35   :  { %p1434_p4 = pnand %p1433_p3, %p1427_p0 }
  0x36   :  { %622 = vperm.xlu1 %1417, %v527_v27  }
  0x37   :  { %610 = vperm.xlu0 %1416, %v526_v28  }
  0x3a   :  { %184 = vperm.xlu1 %1417, %v45_v29  }
  0x3b   :  { %172 = vperm.xlu0 %1416, %v44_v30  }
  0x3e   :  { %419 = vperm.xlu1 %1417, %v280_v31  }
  0x3f   :  { %407 = vperm.xlu0 %1416, %v279_v32  }
  0x42   :  { %646 = vperm.xlu1 %1417, %v529_v33  }
  0x43   :  { %634 = vperm.xlu0 %1416, %v528_v34  }
  0x46   :  { %208 = vperm.xlu1 %1417, %v47_v35  }
  0x47   :  { %196 = vperm.xlu0 %1416, %v46_v36  }
  0x4a   :  { %443 = vperm.xlu1 %1417, %v282_v37  }
  0x4b   :  { %431 = vperm.xlu0 %1416, %v281_v38  }
  0x4e   :  { %670 = vperm.xlu1 %1417, %v531_v39  }
  0x4f   :  { %658 = vperm.xlu0 %1416, %v530_v40  }
  0x52   :  { %232 = vperm.xlu1 %1417, %v49_v41  }
  0x53   :  { %220 = vperm.xlu0 %1416, %v48_v42  }
  0x56   :  { %467 = vperm.xlu1 %1417, %v284_v43  }
  0x57   :  { %455 = vperm.xlu0 %1416, %v283_v44  }
  0x5a   :  { %694 = vperm.xlu1 %1417, %v533_v45  }
  0x5b   :  { %682 = vperm.xlu0 %1416, %v532_v46  }
  0x5e   :  { %718 = vperm.xlu1 %1417, %v535_v47  }
  0x5f   :  { %706 = vperm.xlu0 %1416, %v534_v48  }
  0x62   :  { %1007 = vperm.xlu1 %1417, %v978_v49  }
  0x63   :  { %995 = vperm.xlu0 %1416, %v977_v50  }
  0x66   :  { %1031 = vperm.xlu1 %1417, %v980_v51  }
  0x67   :  { %1019 = vperm.xlu0 %1416, %v979_v52  }
  0x6a   :  { %1055 = vperm.xlu1 %1417, %v982_v53  }
  0x6b   :  { %1043 = vperm.xlu0 %1416, %v981_v54  }
  0x6e   :  { %1079 = vperm.xlu1 %1417, %v984_v56  }
  0x6f   :  { %1067 = vperm.xlu0 %1416, %v983_v57  }
  0x72   :  { %1103 = vperm.xlu1 %1417, %v986_v58  }
  0x73   :  { %1091 = vperm.xlu0 %1416, %v985_v59  }
  0x76   :  { %1127 = vperm.xlu1 %1417, %v988_v60  }
  0x77   :  { %1115 = vperm.xlu0 %1416, %v987_v61  }
  0x7a   :  { %1151 = vperm.xlu1 %1417, %v990_v63  }
  0x7b   :  { %1139 = vperm.xlu0 %1416, %v989_v0  }
  0x7e   :  { %1175 = vperm.xlu1 %1417, %v992_v4  }
  0x7f   :  { %1163 = vperm.xlu0 %1416, %v991_v5  }
  0x81   :  { %v288_v11 = vpop.permute.xlu1 %287 }
  0x82   :  { %v53_v13 = vpop.permute.xlu0 %52  ;;  %v296_v25 = vrot.slane %v288_v11, %v1700_v20 }
  0x83   :  { %v61_v26 = vrot.slane %v53_v13, %v1700_v20 }
  0x84   :  { %v488_v31 = vmul.bf16 %v1702_v21, %v296_v25 }
  0x85   :  { %v300_v18 = vpop.permute.xlu1 %299  ;;  %v253_v32 = vmul.bf16 %v1704_v22, %v61_v26 }
  0x86   :  { %v65_v19 = vpop.permute.xlu0 %64  ;;  %v308_v27 = vrot.slane %v300_v18, %v1700_v20 }
  0x87   :  { %v73_v28 = vrot.slane %v65_v19, %v1700_v20  ;;  %v504_v39 = vadd.bf16 %v488_v31, %v253_v32 }
  0x88   :  { %v489_v33 = vmul.bf16 %v1702_v21, %v308_v27 }
  0x89   :  { %v89_v23 = vpop.permute.xlu1 %88  ;;  %v254_v34 = vmul.bf16 %v1704_v22, %v73_v28 }
  0x8a   :  { %v77_v24 = vpop.permute.xlu0 %76  ;;  %v97_v49 = vrot.slane %v89_v23, %v1700_v20 }
  0x8b   :  { %v505_v37 = vadd.bf16 %v489_v33, %v254_v34  ;;  %v85_v50 = vrot.slane %v77_v24, %v1700_v20 }
  0x8c   :  { %v256_v56 = vmul.bf16 %v1704_v22, %v97_v49 }
  0x8d   :  { %v324_v29 = vpop.permute.xlu1 %323  ;;  %v255_v57 = vmul.bf16 %v1704_v22, %v85_v50 }
  0x8e   :  { %v312_v30 = vpop.permute.xlu0 %311  ;;  %v332_v45 = vrot.slane %v324_v29, %v1700_v20 }
  0x8f   :  { %v320_v46 = vrot.slane %v312_v30, %v1700_v20 }
  0x90   :  { %v491_v54 = vmul.bf16 %v1702_v21, %v332_v45 }
  0x91   :  { %v551_v35 = vpop.permute.xlu1 %550  ;;  %v490_v55 = vmul.bf16 %v1702_v21, %v320_v46 }
  0x92   :  { %v539_v36 = vpop.permute.xlu0 %538  ;;  %v559_v38 = vrot.slane %v551_v35, %v1700_v20  ;;  %v507_v60 = vadd.bf16 %v491_v54, %v256_v56 }
  0x93   :  { %v547_v40 = vrot.slane %v539_v36, %v1700_v20  ;;  %v506_v62 = vadd.bf16 %v490_v55, %v255_v57 }
  0x94   :  { %v729_v41 = vadd.bf16 %v559_v38, %v505_v37 }
  0x95   :  { %v728_v42 = vadd.bf16 %v547_v40, %v504_v39  ;;  %v113_v43 = vpop.permute.xlu1 %112 }
  0x96   :  { %v101_v44 = vpop.permute.xlu0 %100  ;;  %v745_v48 = vmax.bf16 %v1450_v2, %v729_v41  ;;  %v121_v9 = vrot.slane %v113_v43, %v1700_v20 }
  0x97   :  { %v744_v47 = vmax.bf16 %v1450_v2, %v728_v42  ;;  %v109_v10 = vrot.slane %v101_v44, %v1700_v20 }
  0x98   :  { %v258_v16 = vmul.bf16 %v1704_v22, %v121_v9 }
  0x99   :  { %v1318_v51 = vcombine.low %v744_v47, %v745_v48  ;;  %v348_v52 = vpop.permute.xlu1 %347  ;;  %v257_v17 = vmul.bf16 %v1704_v22, %v109_v10 }
  0x9a   :  { %v336_v53 = vpop.permute.xlu0 %335  ;;  %v356_v5 = vrot.slane %v348_v52, %v1700_v20 }
  0x9b   :  { %1359 = vmatprep.subr.bf16.mxu0 %v1318_v51  ;;  %v344_v6 = vrot.slane %v336_v53, %v1700_v20 }
  0x9c   :  { %1360 = vmatpush3.bf16.msra.mxu0 %v1318_v51  ;;  %v493_v14 = vmul.bf16 %v1702_v21, %v356_v5 }
  0x9d   :  { %v575_v58 = vpop.permute.xlu1 %574  ;;  %v492_v15 = vmul.bf16 %v1702_v21, %v344_v6 }
  0x9e   :  { %v563_v59 = vpop.permute.xlu0 %562  ;;  %v583_v61 = vrot.slane %v575_v58, %v1700_v20  ;;  %v509_v23 = vadd.bf16 %v493_v14, %v258_v16 }
  0x9f   :  { %v571_v63 = vrot.slane %v563_v59, %v1700_v20  ;;  %v508_v25 = vadd.bf16 %v492_v15, %v257_v17 }
  0xa0   :  { %v731_v0 = vadd.bf16 %v583_v61, %v507_v60 }
  0xa1   :  { %v730_v1 = vadd.bf16 %v571_v63, %v506_v62  ;;  %v137_v3 = vpop.permute.xlu1 %136 }
  0xa2   :  { %v125_v4 = vpop.permute.xlu0 %124  ;;  %v747_v7 = vmax.bf16 %v1450_v2, %v731_v0  ;;  %v145_v35 = vrot.slane %v137_v3, %v1700_v20 }
  0xa3   :  { %v746_v8 = vmax.bf16 %v1450_v2, %v730_v1  ;;  %v133_v36 = vrot.slane %v125_v4, %v1700_v20 }
  0xa4   :  { %v260_v42 = vmul.bf16 %v1704_v22, %v145_v35 }
  0xa5   :  { %v1319_v11 = vcombine.low %v746_v8, %v747_v7  ;;  %v372_v12 = vpop.permute.xlu1 %371  ;;  %v259_v43 = vmul.bf16 %v1704_v22, %v133_v36 }
  0xa6   :  { %v360_v13 = vpop.permute.xlu0 %359  ;;  %v380_v31 = vrot.slane %v372_v12, %v1700_v20 }
  0xa7   :  { %1361 = vmatprep.subr.bf16.mxu0 %v1319_v11  ;;  %v368_v32 = vrot.slane %v360_v13, %v1700_v20 }
  0xa8   :  { %1362 = vmatpush3.bf16.msra.mxu0 %v1319_v11  ;;  %v495_v40 = vmul.bf16 %v1702_v21, %v380_v31 }
  0xa9   :  { %v599_v18 = vpop.permute.xlu1 %598  ;;  %v494_v41 = vmul.bf16 %v1702_v21, %v368_v32 }
  0xaa   :  { %v587_v19 = vpop.permute.xlu0 %586  ;;  %v607_v24 = vrot.slane %v599_v18, %v1700_v20  ;;  %v511_v46 = vadd.bf16 %v495_v40, %v260_v42 }
  0xab   :  { %v595_v26 = vrot.slane %v587_v19, %v1700_v20  ;;  %v510_v48 = vadd.bf16 %v494_v41, %v259_v43 }
  0xac   :  { %v733_v27 = vadd.bf16 %v607_v24, %v509_v23 }
  0xad   :  { %v732_v28 = vadd.bf16 %v595_v26, %v508_v25  ;;  %v161_v29 = vpop.permute.xlu1 %160 }
  0xae   :  { %v149_v30 = vpop.permute.xlu0 %148  ;;  %v749_v33 = vmax.bf16 %v1450_v2, %v733_v27  ;;  %v169_v58 = vrot.slane %v161_v29, %v1700_v20 }
  0xaf   :  { %v748_v34 = vmax.bf16 %v1450_v2, %v732_v28  ;;  %v157_v59 = vrot.slane %v149_v30, %v1700_v20 }
  0xb0   :  { %v262_v1 = vmul.bf16 %v1704_v22, %v169_v58 }
  0xb1   :  { %v1320_v37 = vcombine.low %v748_v34, %v749_v33  ;;  %v396_v38 = vpop.permute.xlu1 %395  ;;  %v261_v3 = vmul.bf16 %v1704_v22, %v157_v59 }
  0xb2   :  { %v384_v39 = vpop.permute.xlu0 %383  ;;  %v404_v54 = vrot.slane %v396_v38, %v1700_v20 }
  0xb3   :  { %1363 = vmatprep.subr.bf16.mxu0 %v1320_v37  ;;  %v392_v55 = vrot.slane %v384_v39, %v1700_v20 }
  0xb4   :  { %1364 = vmatpush3.bf16.msra.mxu0 %v1320_v37  ;;  %v497_v63 = vmul.bf16 %v1702_v21, %v404_v54 }
  0xb5   :  { %v623_v44 = vpop.permute.xlu1 %622  ;;  %v496_v0 = vmul.bf16 %v1702_v21, %v392_v55 }
  0xb6   :  { %v611_v45 = vpop.permute.xlu0 %610  ;;  %v631_v47 = vrot.slane %v623_v44, %v1700_v20  ;;  %v513_v6 = vadd.bf16 %v497_v63, %v262_v1 }
  0xb7   :  { %v619_v49 = vrot.slane %v611_v45, %v1700_v20  ;;  %v512_v8 = vadd.bf16 %v496_v0, %v261_v3 }
  0xb8   :  { %v735_v50 = vadd.bf16 %v631_v47, %v511_v46 }
  0xb9   :  { %v734_v51 = vadd.bf16 %v619_v49, %v510_v48  ;;  %v185_v52 = vpop.permute.xlu1 %184 }
  0xba   :  { %v173_v53 = vpop.permute.xlu0 %172  ;;  %v751_v56 = vmax.bf16 %v1450_v2, %v735_v50  ;;  %v193_v18 = vrot.slane %v185_v52, %v1700_v20 }
  0xbb   :  { %v750_v57 = vmax.bf16 %v1450_v2, %v734_v51  ;;  %v181_v19 = vrot.slane %v173_v53, %v1700_v20 }
  0xbc   :  { %v264_v28 = vmul.bf16 %v1704_v22, %v193_v18  ;;  %v1419_v18 = vld [vmem:[%s1878_s4 + $0x8] sm:$0xff]  }
  0xbd   :  { %v1321_v60 = vcombine.low %v750_v57, %v751_v56  ;;  %v420_v61 = vpop.permute.xlu1 %419  ;;  %v263_v29 = vmul.bf16 %v1704_v22, %v181_v19  ;;  %v1420_v19 = vld [vmem:[%s1878_s4 + $0x10] sm:$0xff]  }
  0xbe   :  { %v408_v62 = vpop.permute.xlu0 %407  ;;  %v428_v14 = vrot.slane %v420_v61, %v1700_v20 }
  0xbf   :  { %1365 = vmatprep.subr.bf16.mxu0 %v1321_v60  ;;  %v416_v15 = vrot.slane %v408_v62, %v1700_v20 }
  0xc0   :  { %1366 = vmatpush3.bf16.msra.mxu0 %v1321_v60  ;;  %v499_v26 = vmul.bf16 %v1702_v21, %v428_v14 }
  0xc1   :  { %v647_v4 = vpop.permute.xlu1 %646  ;;  %v498_v27 = vmul.bf16 %v1702_v21, %v416_v15 }
  0xc2   :  { %v635_v5 = vpop.permute.xlu0 %634  ;;  %v655_v7 = vrot.slane %v647_v4, %v1700_v20  ;;  %v515_v32 = vadd.bf16 %v499_v26, %v264_v28  ;;  %v1424_v26 = vld [vmem:[%s1878_s4 + $0x30] sm:$0xff]   ;;  %v1452_v28 = vmov 0.0  }
  0xc3   :  { %v643_v9 = vrot.slane %v635_v5, %v1700_v20  ;;  %v514_v34 = vadd.bf16 %v498_v27, %v263_v29  ;;  %v1425_v27 = vld [vmem:[%s1878_s4 + $0x38] sm:$0xff]   ;;  %1391 = vmatprep.subr.bf16.mxu1 %v1452_v28  ;;  %1407 = vmatprep.mubr.msk.bf16.mxu1 %vm1453_vm0, %v1452_v28 }
  0xc4   :  { %v737_v10 = vadd.bf16 %v655_v7, %v513_v6 }
  0xc5   :  { %v736_v11 = vadd.bf16 %v643_v9, %v512_v8  ;;  %v209_v12 = vpop.permute.xlu1 %208 }
  0xc6   :  { %v197_v13 = vpop.permute.xlu0 %196  ;;  %v753_v16 = vmax.bf16 %v1450_v2, %v737_v10  ;;  %v217_v44 = vrot.slane %v209_v12, %v1700_v20 }
  0xc7   :  { %v752_v17 = vmax.bf16 %v1450_v2, %v736_v11  ;;  %v205_v45 = vrot.slane %v197_v13, %v1700_v20 }
  0xc8   :  { %v266_v55 = vmul.bf16 %v1704_v22, %v217_v44 }
  0xc9   :  { %v1322_v23 = vcombine.low %v752_v17, %v753_v16  ;;  %v444_v24 = vpop.permute.xlu1 %443  ;;  %v265_v56 = vmul.bf16 %v1704_v22, %v205_v45 }
  0xca   :  { %v432_v25 = vpop.permute.xlu0 %431  ;;  %v452_v40 = vrot.slane %v444_v24, %v1700_v20  ;;  %v1422_v24 = vld [vmem:[%s1878_s4 + $0x20] sm:$0xff]  }
  0xcb   :  { %1367 = vmatprep.subr.bf16.mxu0 %v1322_v23  ;;  %v440_v41 = vrot.slane %v432_v25, %v1700_v20  ;;  %v1423_v25 = vld [vmem:[%s1878_s4 + $0x28] sm:$0xff]  }
  0xcc   :  { %1368 = vmatpush3.bf16.msra.mxu0 %v1322_v23  ;;  %v501_v49 = vmul.bf16 %v1702_v21, %v452_v40  ;;  %v1421_v23 = vld [vmem:[%s1878_s4 + $0x18] sm:$0xff]  }
  0xcd   :  { %v671_v30 = vpop.permute.xlu1 %670  ;;  %v500_v50 = vmul.bf16 %v1702_v21, %v440_v41 }
  0xce   :  { %v659_v31 = vpop.permute.xlu0 %658  ;;  %v679_v33 = vrot.slane %v671_v30, %v1700_v20  ;;  %v517_v61 = vadd.bf16 %v501_v49, %v266_v55 }
  0xcf   :  { %v667_v35 = vrot.slane %v659_v31, %v1700_v20  ;;  %v516_v63 = vadd.bf16 %v500_v50, %v265_v56 }
  0xd0   :  { %v739_v36 = vadd.bf16 %v679_v33, %v515_v32 }
  0xd1   :  { %v738_v37 = vadd.bf16 %v667_v35, %v514_v34  ;;  %v233_v38 = vpop.permute.xlu1 %232 }
  0xd2   :  { %v221_v39 = vpop.permute.xlu0 %220  ;;  %v755_v42 = vmax.bf16 %v1450_v2, %v739_v36  ;;  %v241_v53 = vrot.slane %v233_v38, %v1700_v20 }
  0xd3   :  { %v754_v43 = vmax.bf16 %v1450_v2, %v738_v37  ;;  %v229_v54 = vrot.slane %v221_v39, %v1700_v20 }
  0xd4   :  { %v268_v1 = vmul.bf16 %v1704_v22, %v241_v53 }
  0xd5   :  { %v1323_v46 = vcombine.low %v754_v43, %v755_v42  ;;  %v468_v47 = vpop.permute.xlu1 %467  ;;  %v267_v3 = vmul.bf16 %v1704_v22, %v229_v54 }
  0xd6   :  { %v456_v48 = vpop.permute.xlu0 %455  ;;  %v476_v51 = vrot.slane %v468_v47, %v1700_v20 }
  0xd7   :  { %v464_v52 = vrot.slane %v456_v48, %v1700_v20  ;;  %1369 = vmatprep.subr.bf16.mxu0 %v1323_v46 }
  0xd8   :  { %1370 = vmatpush3.bf16.msra.mxu0 %v1323_v46  ;;  %v503_v57 = vmul.bf16 %v1702_v21, %v476_v51 }
  0xd9   :  { %v502_v58 = vmul.bf16 %v1702_v21, %v464_v52  ;;  %v695_v59 = vpop.permute.xlu1 %694 }
  0xda   :  { %v683_v60 = vpop.permute.xlu0 %682  ;;  %v703_v62 = vrot.slane %v695_v59, %v1700_v20  ;;  %v519_v7 = vadd.bf16 %v503_v57, %v268_v1 }
  0xdb   :  { %v691_v0 = vrot.slane %v683_v60, %v1700_v20  ;;  %v518_v9 = vadd.bf16 %v502_v58, %v267_v3 }
  0xdc   :  { %v741_v4 = vadd.bf16 %v703_v62, %v517_v61 }
  0xdd   :  { %v740_v5 = vadd.bf16 %v691_v0, %v516_v63  ;;  %v719_v6 = vpop.permute.xlu1 %718 }
  0xde   :  { %v707_v8 = vpop.permute.xlu0 %706  ;;  %v757_v21 = vmax.bf16 %v1450_v2, %v741_v4  ;;  %v727_v11 = vrot.slane %v719_v6, %v1700_v20 }
  0xdf   :  { %v756_v10 = vmax.bf16 %v1450_v2, %v740_v5  ;;  %v715_v12 = vrot.slane %v707_v8, %v1700_v20 }
  0xe0   :  { %v743_v13 = vadd.bf16 %v727_v11, %v519_v7 }
  0xe1   :  { %v742_v14 = vadd.bf16 %v715_v12, %v518_v9  ;;  %v1324_v15 = vcombine.low %v756_v10, %v757_v21  ;;  %v1008_v29 = vpop.permute.xlu1 %1007 }
  0xe2   :  { %v759_v16 = vmax.bf16 %v1450_v2, %v743_v13  ;;  %v996_v30 = vpop.permute.xlu0 %995  ;;  %v1016_v37 = vrot.slane %v1008_v29, %v1700_v20 }
  0xe3   :  { %v758_v22 = vmax.bf16 %v1450_v2, %v742_v14  ;;  %1371 = vmatprep.subr.bf16.mxu0 %v1324_v15  ;;  %v1004_v38 = vrot.slane %v996_v30, %v1700_v20 }
  0xe4   :  { %1372 = vmatpush3.bf16.msra.mxu0 %v1324_v15 }
  0xe5   :  { %v1325_v17 = vcombine.low %v758_v22, %v759_v16  ;;  %v1032_v31 = vpop.permute.xlu1 %1031  ;;  %v1326_v46 = vcombine.low %v1004_v38, %v1016_v37 }
  0xe6   :  { %v1020_v32 = vpop.permute.xlu0 %1019  ;;  %v1040_v41 = vrot.slane %v1032_v31, %v1700_v20 }
  0xe7   :  { %1373 = vmatprep.subr.bf16.mxu0 %v1325_v17  ;;  %v1028_v42 = vrot.slane %v1020_v32, %v1700_v20 }
  0xe8   :  { %1374 = vmatpush3.bf16.msra.mxu0 %v1325_v17 }
  0xe9   :  { %v1056_v33 = vpop.permute.xlu1 %1055  ;;  %v1327_v50 = vcombine.low %v1028_v42, %v1040_v41 }
  0xea   :  { %v1044_v34 = vpop.permute.xlu0 %1043  ;;  %v1064_v52 = vrot.slane %v1056_v33, %v1700_v20 }
  0xeb   :  { %1376 = vmatmul.mubr.bf16.vlgmr.msra.gmra.mrb[0].mxu0 %v1419_v18  ;;  %v1052_v53 = vrot.slane %v1044_v34, %v1700_v20 }
  0xec   :  { %1379 = vmatprep.mubr.bf16.mxu0 %v1420_v19 }
  0xed   :  { %v1080_v35 = vpop.permute.xlu1 %1079  ;;  %v1328_v1 = vcombine.low %v1052_v53, %v1064_v52 }
  0xee   :  { %v1068_v36 = vpop.permute.xlu0 %1067  ;;  %v1088_v58 = vrot.slane %v1080_v35, %v1700_v20 }
  0xef   :  { %v1076_v59 = vrot.slane %v1068_v36, %v1700_v20 }
  0xf1   :  { %v1104_v47 = vpop.permute.xlu1 %1103  ;;  %v1329_v5 = vcombine.low %v1076_v59, %v1088_v58 }
  0xf2   :  { %v1092_v49 = vpop.permute.xlu0 %1091  ;;  %v1112_v7 = vrot.slane %v1104_v47, %v1700_v20  ;;  %v1249_v47 = vld [vmem:[%s1880_s6] sm:$0xf] }
  0xf3   :  { %1380 = vmatmul.mubr.bf16.gmra.mrb[4].mxu0 %v1421_v23  ;;  %v1100_v8 = vrot.slane %v1092_v49, %v1700_v20 }
  0xf4   :  { %1383 = vmatprep.mubr.bf16.mxu0 %v1422_v24 }
  0xf5   :  { %v1128_v60 = vpop.permute.xlu1 %1127  ;;  %v1330_v18 = vcombine.low %v1100_v8, %v1112_v7 }
  0xf6   :  { %v1116_v62 = vpop.permute.xlu0 %1115  ;;  %v1136_v14 = vrot.slane %v1128_v60, %v1700_v20 }
  0xf7   :  { %v1124_v15 = vrot.slane %v1116_v62, %v1700_v20 }
  0xf9   :  { %v1152_v9 = vpop.permute.xlu1 %1151  ;;  %v1331_v24 = vcombine.low %v1124_v15, %v1136_v14 }
  0xfa   :  { %v1140_v12 = vpop.permute.xlu0 %1139  ;;  %v1160_v29 = vrot.slane %v1152_v9, %v1700_v20 }
  0xfb   :  { %1384 = vmatmul.mubr.bf16.gmra.mrb[8].mxu0 %v1423_v25  ;;  %v1148_v30 = vrot.slane %v1140_v12, %v1700_v20 }
  0xfc   :  { %1387 = vmatprep.mubr.bf16.mxu0 %v1424_v26 }
  0xfd   :  { %v1176_v26 = vpop.permute.xlu1 %1175 }
  0xfe   :  { %v1184_v35 = vrot.slane %v1176_v26, %v1700_v20 }
 0x103   :  { %1388 = vmatmul.mubr.bf16.gmra.mrb[12].mxu0 %v1425_v27  ;;  %v1164_v27 = vpop.permute.xlu0 %1163 }
 0x104   :  { %v1172_v36 = vrot.slane %v1164_v27, %v1700_v20 }
 0x1be   :  { %v1377_v39 = vpop.f32.mrb[0].mxu0 }
 0x1bf   :  { %v906_v40 = vpop.f32.mrb[1].mxu0 }
 0x1c0   :  { %v1378_v43 = vpop.f32.mrb[2].mxu0 }
 0x1c1   :  { %v970_v44 = vpack.c.bf16 %v1378_v43, %v1377_v39  ;;  %v909_v45 = vpop.f32.mrb[3].mxu0  ;;  %v1333_v43 = vcombine.low %v1172_v36, %v1184_v35 }
 0x1c2   :  { %v969_v48 = vpack.c.bf16 %v909_v45, %v906_v40  ;;  %v1332_v40 = vcombine.low %v1148_v30, %v1160_v29 }
 0x1c3   :  { %v1234_v54 = vadd.bf16 %v1327_v50, %v970_v44 }
 0x1c4   :  { %v1233_v51 = vadd.bf16 %v1326_v46, %v969_v48  ;;  %v1291_v48 = vstv %s1881_s7 }
 0x1c5   :  { %v1242_v4 = vmax.bf16 %v1450_v2, %v1234_v54 }
 0x1c6   :  { %v1381_v55 = vpop.f32.mrb[4].mxu0  ;;  %v1241_v56 = vmax.bf16 %v1450_v2, %v1233_v51 }
 0x1c7   :  { %v922_v57 = vpop.f32.mrb[5].mxu0 }
 0x1c8   :  { %v1382_v61 = vpop.f32.mrb[6].mxu0  ;;  %1392 = vmatpush3.bf16.msra.mxu1 %v1241_v56 }
 0x1c9   :  { %v972_v63 = vpack.c.bf16 %v1382_v61, %v1381_v55  ;;  %v925_v0 = vpop.f32.mrb[7].mxu0  ;;  %1393 = vmatprep.subr.bf16.mxu1 %v1452_v28 }
 0x1ca   :  { %v971_v3 = vpack.c.bf16 %v925_v0, %v922_v57 }
 0x1cb   :  { %v1236_v21 = vadd.bf16 %v1329_v5, %v972_v63 }
 0x1cc   :  { %v1235_v6 = vadd.bf16 %v1328_v1, %v971_v3  ;;  %1394 = vmatpush3.bf16.msra.mxu1 %v1242_v4 }
 0x1cd   :  { %1395 = vmatprep.subr.bf16.mxu1 %v1452_v28  ;;  %v1244_v23 = vmax.bf16 %v1450_v2, %v1236_v21 }
 0x1ce   :  { %v1385_v10 = vpop.f32.mrb[8].mxu0  ;;  %v1243_v11 = vmax.bf16 %v1450_v2, %v1235_v6 }
 0x1cf   :  { %v938_v13 = vpop.f32.mrb[9].mxu0 }
 0x1d0   :  { %v1386_v16 = vpop.f32.mrb[10].mxu0  ;;  %1396 = vmatpush3.bf16.msra.mxu1 %v1243_v11 }
 0x1d1   :  { %v974_v22 = vpack.c.bf16 %v1386_v16, %v1385_v10  ;;  %v941_v17 = vpop.f32.mrb[11].mxu0  ;;  %1397 = vmatprep.subr.bf16.mxu1 %v1452_v28 }
 0x1d2   :  { %v973_v19 = vpack.c.bf16 %v941_v17, %v938_v13 }
 0x1d3   :  { %v1238_v31 = vadd.bf16 %v1331_v24, %v974_v22 }
 0x1d4   :  { %v1237_v25 = vadd.bf16 %v1330_v18, %v973_v19  ;;  %1398 = vmatpush3.bf16.msra.mxu1 %v1244_v23 }
 0x1d5   :  { %1399 = vmatprep.subr.bf16.mxu1 %v1452_v28  ;;  %v1246_v42 = vmax.bf16 %v1450_v2, %v1238_v31 }
 0x1d6   :  { %v1389_v32 = vpop.f32.mrb[12].mxu0  ;;  %v1245_v33 = vmax.bf16 %v1450_v2, %v1237_v25 }
 0x1d7   :  { %v954_v34 = vpop.f32.mrb[13].mxu0 }
 0x1d8   :  { %v1390_v37 = vpop.f32.mrb[14].mxu0  ;;  %1400 = vmatpush3.bf16.msra.mxu1 %v1245_v33 }
 0x1d9   :  { %v976_v38 = vpack.c.bf16 %v1390_v37, %v1389_v32  ;;  %v957_v39 = vpop.f32.mrb[15].mxu0  ;;  %1401 = vmatprep.subr.bf16.mxu1 %v1452_v28 }
 0x1da   :  { %v975_v41 = vpack.c.bf16 %v957_v39, %v954_v34 }
 0x1db   :  { %v1240_v45 = vadd.bf16 %v1333_v43, %v976_v38 }
 0x1dc   :  { %v1239_v44 = vadd.bf16 %v1332_v40, %v975_v41  ;;  %1402 = vmatpush3.bf16.msra.mxu1 %v1246_v42 }
 0x1dd   :  { %1403 = vmatprep.subr.bf16.mxu1 %v1452_v28  ;;  %v1248_v20 = vmax.bf16 %v1450_v2, %v1240_v45 }
 0x1de   :  { %v1247_v46 = vmax.bf16 %v1450_v2, %v1239_v44 }
 0x1e0   :  { %1404 = vmatpush3.bf16.msra.mxu1 %v1247_v46 }
 0x1e1   :  { %1405 = vmatprep.subr.bf16.mxu1 %v1452_v28 }
 0x1e4   :  { %1406 = vmatpush3.bf16.msra.mxu1 %v1248_v20 }
 0x1e7   :  { %1408 = vmatmul.mubr.bf16.vlgmr.msra.gmra.mrb[0].mxu1 %v1249_v47 }
 0x2ba   :  { %v1284_v49 = vpop.f32.mrb[0].mxu1 }
 0x2bb   :  { %v1292_v50 = vadd.f32 %v1291_v48, %v1284_v49  ;;  %v1409_v51 = vpop.f32.mrb[1].mxu1 }
 0x2bc   :  { %v1287_v52 = vpop.f32.mrb[2].mxu1 }
 0x2bd   :  { %1293 = vst [vmem:[#allocation3] sm:$0x1] %v1292_v50  ;;  %v1410_v28 = vpop.f32.mrb[3].mxu1 }
 0x2be   :  { %1437 = shalt.err (!%p1434_p4)
}
 0x2bf   :  { %s1438_s7 = scalar_lea.hbm %s1882_s8, 16 }
 0x2c0   :  { %p1439_p5 = scmp.ne.s32.totalorder %s1882_s8, %s1438_s7  ;;  %p1442_p6 = scmp.lt.u32.totalorder %s1438_s7, %s1882_s8 }
 0x2c2   :  { %p1444_p7 = pnand %p1442_p6, %p1439_p5 }
 0x2c4   :  { %1447 = shalt.err (!%p1444_p7)
}
 0x2c5   :  { %1303 = dma.vmem_to_hbm [thread:$0]  %s1301_s13, 16, %s1882_s8, [#allocation4]  }
 0x2c6   :  { %1448 = dma.done.wait [#allocation4], 16  }
 0x2c7   :  { %1449 = vsyncadd [#allocation4], 4294967280 }
 0x2c8   :  { %1307 = vsyncpa [#allocation4], 1 }

</bundles_post_ra>
